<compile_context>
chip_gen: v7x
topology: tpu7x:2x2x1
jax: 0.10.0
libtpu: 0.0.40
codegen_flags: <defaults>
</compile_context>

<pallas_src>
import numpy as np
import jax
import jax.numpy as jnp
from jax.experimental import pallas as pl
from jax.experimental.pallas import tpu as pltpu


# ---------------------------------------------------------------------------
# Exact linear operators for AdaptiveAvgPool2d and bilinear upsampling
# ---------------------------------------------------------------------------
def adaptive_avg_pool_matrix(in_size: int, out_size: int) -> np.ndarray:
    """P @ x averages x over PyTorch AdaptiveAvgPool1d bins."""
    P = np.zeros((out_size, in_size), dtype=np.float32)
    for o in range(out_size):
        start = (o * in_size) // out_size
        end = -((-(o + 1) * in_size) // out_size)  # ceil((o+1)*in/out)
        P[o, start:end] = 1.0 / (end - start)
    return P


def bilinear_upsample_matrix(in_size: int, out_size: int) -> np.ndarray:
    """U[out, in]: 1-D bilinear interpolation, align_corners=False."""
    U = np.zeros((out_size, in_size), dtype=np.float32)
    scale = in_size / out_size
    for i in range(out_size):
        src = (i + 0.5) * scale - 0.5
        src = max(src, 0.0)
        i0 = min(int(np.floor(src)), in_size - 1)
        i1 = min(i0 + 1, in_size - 1)
        lam = src - i0
        U[i, i0] += 1.0 - lam
        U[i, i1] += lam
    return U


def _round_up(x: int, m: int) -> int:
    return ((x + m - 1) // m) * m


# ---------------------------------------------------------------------------
# Pallas kernel:  out[n, :, hw_tile] = relu( W_id @ x[n, :, hw_tile]
#                                            + Y[n] @ B^T[:, hw_tile] )
#   W_id : identity-branch bottleneck slice, resident in VMEM (bf16)
#   x    : feats in NCHW, spatial flattened on the lane axis (bf16)
#   Y    : per-stage conv results + bias column, (n, D, S) f32 (tiny)
#   B^T  : stacked upsample basis + ones column, (S, HW) f32
# Single dot per tile (K un-blocked) -> no accumulator scratch needed.
# ---------------------------------------------------------------------------
def _psp_kernel(x_ref, w_ref, y_ref, bT_ref, o_ref):
    acc = jnp.dot(w_ref[...], x_ref[0],
                  preferred_element_type=jnp.float32)            # (D_p, thw)
    acc = acc + jnp.dot(y_ref[0], bT_ref[...],
                        preferred_element_type=jnp.float32)      # residual+bias
    o_ref[0] = jnp.maximum(acc, 0.0).astype(o_ref.dtype)


def _vmem_bytes(C_p, D_p, S_p, thw):
    """Rough double-buffered working-set estimate for the kernel."""
    x = C_p * thw * 2          # bf16
    w = D_p * C_p * 2          # bf16, resident
    y = D_p * S_p * 4          # f32
    bT = S_p * thw * 4         # f32
    o = D_p * thw * 4          # f32
    return 2 * (x + w + y + bT + o) + D_p * thw * 4   # + dot-result margin


_VMEM_BUDGET = 28 * 1024 * 1024   # keep headroom on v7x (64 MiB physical)


# ---------------------------------------------------------------------------
# PSPModule forward
# ---------------------------------------------------------------------------
def psp_forward(feats, params, sizes=(1, 2, 3, 6), *, thw=512):
    """feats: (N, C, H, W) float32 (NCHW, same as PyTorch). Returns NCHW."""
    n, c, h, w = feats.shape
    hw = h * w
    bott_w = params["bottleneck_w"]            # (out, (len(sizes)+1)*c)
    bott_b = params["bottleneck_b"]            # (out,)
    out_f = bott_w.shape[0]

    # ---- Single-pass stacked adaptive pooling (one read of feats) ----
    Ph = np.concatenate([adaptive_avg_pool_matrix(h, s) for s in sizes], 0)
    Pw = np.concatenate([adaptive_avg_pool_matrix(w, s) for s in sizes], 0)
    pooled_all = jnp.einsum("oh,nchw,pw->ncop",
                            jnp.asarray(Ph), feats, jnp.asarray(Pw))

    # ---- Per-stage fused conv (stage 1x1 conv * bottleneck slice) ----
    ys, basis_blocks = [], []
    off = 0
    for i, s in enumerate(sizes):
        w_stage = params["stage_weights"][i]                       # (c, c)
        fused_w = bott_w[:, i * c:(i + 1) * c] @ w_stage           # (out, c)
        pooled = pooled_all[:, :, off:off + s, off:off + s]        # (n,c,s,s)
        y = jnp.einsum("dc,ncop->ndop", fused_w, pooled)           # (n,out,s,s)
        ys.append(y.reshape(n, out_f, s * s))
        U_h = bilinear_upsample_matrix(s, h)                       # (h, s)
        U_w = bilinear_upsample_matrix(s, w)                       # (w, s)
        basis_blocks.append(np.kron(U_h, U_w))                     # (hw, s*s)
        off += s

    # Fold the bias in as one extra basis column of ones.
    Y = jnp.concatenate(
        ys + [jnp.broadcast_to(bott_b[None, :, None], (n, out_f, 1))], axis=2)
    B = np.concatenate(basis_blocks + [np.ones((hw, 1), np.float32)], axis=1)
    S = B.shape[1]                                                 # 51 typ.

    # ---- Padding / tiling (lane-dense, 128-aligned spatial tiles) ----
    C_p = _round_up(c, 8)
    D_p = _round_up(out_f, 8)
    S_p = _round_up(S, 128)
    thw = min(thw, _round_up(hw, 128))
    while thw > 128 and _vmem_bytes(C_p, D_p, S_p, thw) > _VMEM_BUDGET:
        thw = max(128, (thw // 2) // 128 * 128)
    HW_p = _round_up(hw, thw)

    # Cast-then-pad: one XLA pass over feats, bf16 from the start.
    x_p = jnp.pad(feats.astype(jnp.bfloat16).reshape(n, c, hw),
                  ((0, 0), (0, C_p - c), (0, HW_p - hw)))
    w_id = bott_w[:, len(sizes) * c:].astype(jnp.bfloat16)         # (out, c)
    w_p = jnp.pad(w_id, ((0, D_p - out_f), (0, C_p - c)))
    y_p = jnp.pad(Y.astype(jnp.float32),
                  ((0, 0), (0, D_p - out_f), (0, S_p - S)))
    bT_p = jnp.pad(jnp.asarray(B.T, jnp.float32),
                   ((0, S_p - S), (0, HW_p - hw)))

    grid = (n, HW_p // thw)

    out = pl.pallas_call(
        _psp_kernel,
        out_shape=jax.ShapeDtypeStruct((n, D_p, HW_p), jnp.float32),
        grid_spec=pltpu.PrefetchScalarGridSpec(
            num_scalar_prefetch=0,
            grid=grid,
            in_specs=[
                pl.BlockSpec((1, C_p, thw), lambda b, l: (b, 0, l)),   # x
                pl.BlockSpec((D_p, C_p),    lambda b, l: (0, 0)),      # W (resident)
                pl.BlockSpec((1, D_p, S_p), lambda b, l: (b, 0, 0)),   # Y
                pl.BlockSpec((S_p, thw),    lambda b, l: (0, l)),      # B^T
            ],
            out_specs=pl.BlockSpec((1, D_p, thw), lambda b, l: (b, 0, l)),
        ),
        compiler_params=pltpu.CompilerParams(
            dimension_semantics=("parallel", "parallel"),
            vmem_limit_bytes=64 * 1024 * 1024),
    )(x_p, w_p, y_p, bT_p)

    return out[:, :out_f, :hw].reshape(n, out_f, h, w)              # NCHW


def init_params(key, features, out_features, sizes=(1, 2, 3, 6)):
    keys = jax.random.split(key, len(sizes) + 2)
    stage_weights = [
        jax.random.normal(keys[i], (features, features), jnp.float32) * 0.1
        for i in range(len(sizes))
    ]
    k_in = features * (len(sizes) + 1)
    bottleneck_w = jax.random.normal(
        keys[-2], (out_features, k_in), jnp.float32) * 0.1
    bottleneck_b = jax.random.normal(keys[-1], (out_features,), jnp.float32) * 0.1
    return {
        "stage_weights": stage_weights,
        "bottleneck_w": bottleneck_w,
        "bottleneck_b": bottleneck_b,
    }


# ---------------------------------------------------------------------------
# Pure-JAX reference (direct transcription of the PyTorch module: pool ->
# stage conv -> upsample -> concat -> bottleneck conv -> bias -> ReLU).
# ---------------------------------------------------------------------------
def ref_forward(feats, params, sizes=(1, 2, 3, 6)):
    n, c, h, w = feats.shape
    priors = []
    for s, w_stage in zip(sizes, params["stage_weights"]):
        P_h = jnp.asarray(adaptive_avg_pool_matrix(h, s))
        P_w = jnp.asarray(adaptive_avg_pool_matrix(w, s))
        pooled = jnp.einsum("oh,nchw,pw->ncop", P_h, feats, P_w)
        conv = jnp.einsum("dc,ncop->ndop", w_stage, pooled)
        U_h = jnp.asarray(bilinear_upsample_matrix(s, h))
        U_w = jnp.asarray(bilinear_upsample_matrix(s, w))
        priors.append(jnp.einsum("ho,ndop,wp->ndhw", U_h, conv, U_w))
    priors.append(feats)
    x = jnp.concatenate(priors, axis=1)
    y = jnp.einsum("ok,nkhw->nohw", params["bottleneck_w"], x)
    y = y + params["bottleneck_b"][None, :, None, None]
    return jnp.maximum(y, 0.0)


if __name__ == "__main__":
    key = jax.random.PRNGKey(0)
    k_x, k_p = jax.random.split(key)

    N, C, H, W = 2, 4, 16, 16
    OUT_FEATURES = 32  # small stand-in for the default 1024
    SIZES = (1, 2, 3, 6)

    feats = jax.random.normal(k_x, (N, C, H, W), jnp.float32)
    params = init_params(k_p, C, OUT_FEATURES, SIZES)

    fwd = jax.jit(lambda f, p: psp_forward(f, p, SIZES))
    out = jax.block_until_ready(fwd(feats, params))
    assert out.shape == (N, OUT_FEATURES, H, W), out.shape

    ref = jax.block_until_ready(ref_forward(feats, params, SIZES))
    # Identity-branch matmul uses bf16 inputs (f32 accumulate) -> loose tol.
    np.testing.assert_allclose(np.asarray(out), np.asarray(ref),
                               rtol=2e-2, atol=2e-2)

    print("KERNEL_OK")
</pallas_src>

<mosaic_0001>
module attributes {stable_mosaic.version = 11 : i64} {
  func.func @_psp_kernel(%arg0: i32, %arg1: i32, %arg2: memref<1x8x256xbf16, #tpu.memory_space<vmem>>, %arg3: memref<32x8xbf16, #tpu.memory_space<vmem>>, %arg4: memref<1x32x128xf32, #tpu.memory_space<vmem>>, %arg5: memref<128x256xf32, #tpu.memory_space<vmem>>, %arg6: memref<1x32x256xf32, #tpu.memory_space<vmem>>) attributes {dimension_semantics = [#tpu.dimension_semantics<parallel>, #tpu.dimension_semantics<parallel>], iteration_bounds = array<i64: 2, 1>, scalar_prefetch = 0 : i64, scratch_operands = 0 : i64, tpu.core_type = #tpu.core_type<tc>, window_params = [{transform_indices = @transform_0, window_bounds = array<i64: 1, 8, 256>}, {pipeline_mode = #tpu.pipeline_mode<synchronous>, transform_indices = @transform_1, window_bounds = array<i64: 32, 8>}, {transform_indices = @transform_2, window_bounds = array<i64: 1, 32, 128>}, {transform_indices = @transform_3, window_bounds = array<i64: 128, 256>}, {transform_indices = @transform_4, window_bounds = array<i64: 1, 32, 256>}]} {
    %c0 = arith.constant 0 : index
    %c0_0 = arith.constant 0 : index
    %0 = vector.load %arg3[%c0, %c0_0] : memref<32x8xbf16, #tpu.memory_space<vmem>>, vector<32x8xbf16>
    %c0_1 = arith.constant 0 : index
    %c0_2 = arith.constant 0 : index
    %c0_3 = arith.constant 0 : index
    %1 = vector.load %arg2[%c0_1, %c0_2, %c0_3] : memref<1x8x256xbf16, #tpu.memory_space<vmem>>, vector<1x8x256xbf16>
    %2 = vector.shape_cast %1 : vector<1x8x256xbf16> to vector<8x256xbf16>
    %cst = arith.constant dense<0.000000e+00> : vector<32x256xf32>
    %3 = tpu.matmul %0, %2, %cst {dimension_numbers = #tpu.dot_dimension_numbers<[1], [0], [0], [1], [0, 0, 1, 1], [], []>} : vector<32x8xbf16>, vector<8x256xbf16>, vector<32x256xf32> -> vector<32x256xf32>
    %c0_4 = arith.constant 0 : index
    %c0_5 = arith.constant 0 : index
    %c0_6 = arith.constant 0 : index
    %4 = vector.load %arg4[%c0_4, %c0_5, %c0_6] : memref<1x32x128xf32, #tpu.memory_space<vmem>>, vector<1x32x128xf32>
    %5 = vector.shape_cast %4 : vector<1x32x128xf32> to vector<32x128xf32>
    %c0_7 = arith.constant 0 : index
    %c0_8 = arith.constant 0 : index
    %6 = vector.load %arg5[%c0_7, %c0_8] : memref<128x256xf32, #tpu.memory_space<vmem>>, vector<128x256xf32>
    %cst_9 = arith.constant dense<0.000000e+00> : vector<32x256xf32>
    %7 = tpu.matmul %5, %6, %cst_9 {dimension_numbers = #tpu.dot_dimension_numbers<[1], [0], [0], [1], [0, 0, 1, 1], [], []>} : vector<32x128xf32>, vector<128x256xf32>, vector<32x256xf32> -> vector<32x256xf32>
    %8 = arith.addf %3, %7 : vector<32x256xf32>
    %cst_10 = arith.constant 0.000000e+00 : f32
    %9 = vector.broadcast %cst_10 : f32 to vector<32x256xf32>
    %10 = arith.maximumf %8, %9 : vector<32x256xf32>
    %c0_11 = arith.constant 0 : index
    %c0_12 = arith.constant 0 : index
    %c0_13 = arith.constant 0 : index
    %11 = vector.load %arg6[%c0_11, %c0_12, %c0_13] : memref<1x32x256xf32, #tpu.memory_space<vmem>>, vector<1x32x256xf32>
    %12 = vector.shape_cast %11 : vector<1x32x256xf32> to vector<32x256xf32>
    %13 = vector.shape_cast %10 : vector<32x256xf32> to vector<1x32x256xf32>
    tpu.vector_store %arg6[%c0_11, %c0_12, %c0_13], %13 {strides = array<i32>} : memref<1x32x256xf32, #tpu.memory_space<vmem>>, vector<1x32x256xf32>,
    return
  }
  func.func @transform_0(%arg0: i32, %arg1: i32) -> (i32, i32, i32) {
    %c0_i32 = arith.constant 0 : i32
    %c0_i32_0 = arith.constant 0 : i32
    return %arg0, %c0_i32, %arg1 : i32, i32, i32
  }
  func.func @transform_1(%arg0: i32, %arg1: i32) -> (i32, i32) {
    %c0_i32 = arith.constant 0 : i32
    %c0_i32_0 = arith.constant 0 : i32
    %c0_i32_1 = arith.constant 0 : i32
    return %c0_i32, %c0_i32_0 : i32, i32
  }
  func.func @transform_2(%arg0: i32, %arg1: i32) -> (i32, i32, i32) {
    %c0_i32 = arith.constant 0 : i32
    %c0_i32_0 = arith.constant 0 : i32
    %c0_i32_1 = arith.constant 0 : i32
    return %arg0, %c0_i32, %c0_i32_0 : i32, i32, i32
  }
  func.func @transform_3(%arg0: i32, %arg1: i32) -> (i32, i32) {
    %c0_i32 = arith.constant 0 : i32
    %c0_i32_0 = arith.constant 0 : i32
    return %c0_i32, %arg1 : i32, i32
  }
  func.func @transform_4(%arg0: i32, %arg1: i32) -> (i32, i32, i32) {
    %c0_i32 = arith.constant 0 : i32
    %c0_i32_0 = arith.constant 0 : i32
    return %arg0, %c0_i32, %arg1 : i32, i32, i32
  }
}

</mosaic_0001>

<bundles_post_ra>
// kernel: _lambda_.1
= control target key start
LH: loop header
LB: loop body
LE: loop exit
PB: predicated region body
PF: predicated region fallthrough
CT: control target
= control target key end

     0   :  { %s1405_s0 = inlined_call_operand.hbm [shape: bf16[2,8,256], index: 0, kind: input, shape index: {}]   ;;  %s1406_s1 = inlined_call_operand.hbm [shape: bf16[32,8], index: 1, kind: input, shape index: {}]   ;;  %s1407_s2 = inlined_call_operand.hbm [shape: f32[2,32,128], index: 2, kind: input, shape index: {}]   ;;  %s1408_s3 = inlined_call_operand.hbm [shape: f32[128,256], index: 3, kind: input, shape index: {}]   ;;  %s1409_s4 = inlined_call_operand.hbm [shape: f32[2,32,256], index: 4, kind: output, shape index: {}]  }
   0x1   :  { %1419 = sst [smem:[#allocation16_spill]] %s1405_s0 }
   0x2   :  { %1420 = sst [smem:[#allocation17_spill]] %s1406_s1 }
   0x3   :  { %9 = vsyncpa [#allocation3], 0 }
   0x4   :  { %11 = vsyncpa [#allocation3 + $0x1], 0 }
   0x5   :  { %12 = vsyncpa [#allocation6], 0 }
   0x6   :  { %13 = vsyncpa [#allocation4], 0 }
   0x7   :  { %15 = vsyncpa [#allocation4 + $0x1], 0  ;;  %s1101_s15 = smov 0   ;;  %s1103_s16 = smov 0  }
   0x8   :  { %s1105_s17 = smov 0   ;;  %s1107_s18 = smov 0  }
   0x9   :  { %s1109_s19 = smov 0   ;;  %s1111_s20 = smov 0  }
   0xa LB: > { %s1132_s21 = sadd.s32 4294967295, %s1059_s20   ;;  %s683_s22 = sadd.s32 4294967294, %s1059_s20   ;;  %s1059_s20 = sphi %s1111_s20, %s21_s20   ;;  %s1055_s19 = sphi %s1109_s19, %s1451_s19   ;;  %s1051_s18 = sphi %s1107_s18, %s1450_s18   ;;  %s1047_s17 = sphi %s1105_s17, %s1449_s17   ;;  %s1043_s16 = sphi %s1103_s16, %s1448_s16   ;;  %s1039_s15 = sphi %s1101_s15, %s1447_s15  }
   0xb   : > { %p55_p0 = scmp.ne.s32.totalorder %s1043_s16, %s1039_s15  ;;  %p1410_p1 = scmp.eq.s32.totalorder %s1132_s21, 0 }
   0xc   : > { %p160_p3 = scmp.eq.s32.totalorder %s683_s22, 1  ;;  %p684_p5 = scmp.ge.s32.totalorder %s1059_s20, 1 }
   0xd   : > { %p1141_p4 = por %p1410_p1, %p55_p0  ;;  %p167_p7 = scmp.lt.s32.totalorder %s1059_s20, 3 }
   0xe   : > { %p1146_p6 = por %p160_p3, %p55_p0  ;;  %s1061_s26 = smov [#allocation5]  }
   0xf   : > { %s1421_s23 = scalar_select %p1141_p4, 1, 0 }
  0x10   : > { %s1422_s24 = scalar_select %p1146_p6, 1, 0 }
  0x11   : > { %p1151_p8 = pnand %p684_p5, %p167_p7  ;;  %s179_s27 = sshll.u32 %s1061_s26, 4  ;;  %s180_s27 = int_to_ptr.vmem [resolvable:$true] %s179_s27 }
  0x12   : > { %s33_s29 = sadd.s32 1, %s1055_s19  ;;  %s1425_s1 = sld [smem:[#allocation17_spill]] }
  0x13   : > { %s1423_s25 = scalar_select %p1151_p8, 1, 0 }
  0x14   : > { %p761_p9 = pneg %p1151_p8 }
  0x16   : > { %p1160_p11 = pnand %p761_p9, %p1410_p1 }
  0x18   : > { %s849_s6 = scalar_lea.hbm %s1425_s1, 256  ;;  %p1413_p13 = pneg %p1160_p11 }
  0x19   : > { %p850_p12 = scmp.ne.s32.totalorder %s1425_s1, %s849_s6  ;;  %p856_p5 = scmp.lt.u32.totalorder %s849_s6, %s1425_s1 }
  0x1b   : > { %p852_p0 = pnand %p1413_p13, %p850_p12 }
  0x1d   : > { %p853_p3 = pneg %p852_p0 }
  0x1f   : > { %p858_p7 = pnand %p856_p5, %p853_p3 }
  0x21   : > { %861 = shalt.err (!%p858_p7)
}
  0x22   : > { %s862_s11 = scalar_lea.vmem %s180_s27, 256  ;;  %p870_p2 = scmp.lt.s32.totalorder %s180_s27, %s180_s27 }
  0x23   : > { %p863_p9 = scmp.ne.s32.totalorder %s180_s27, %s862_s11  ;;  %p871_p6 = scmp.lt.s32.totalorder %s862_s11, %s862_s11 }
  0x25   : > { %p865_p10 = pnand %p863_p9, %p1413_p13  ;;  %p872_p4 = por %p871_p6, %p870_p2 }
  0x27   : > { %p866_p1 = pneg %p865_p10 }
  0x29   : > { %p873_p8 = pnand %p872_p4, %p866_p1 }
  0x2b   : > { %876 = shalt.err (!%p873_p8)
}
  0x2c   : > { %s1062_s12 = smov 64   ;;  %s1063_s13 = smov 4  }
  0x2d   : > { %764 = dma.hbm_to_vmem [thread:$0]  (!%p1160_p11), %s1425_s1, 256, %s180_s27, [#allocation6], %s1062_s12, %s1062_s12, %s1063_s13  }
  0x2e   : > { %p35_p1 = scmp.ge.s32.totalorder %s33_s29, 2  ;;  %s42_s26 = sadd.s32 1, %s1047_s17 }
  0x2f   : > { %p49_p2 = scmp.ne.s32.totalorder %s1047_s17, %s1043_s16  ;;  %p50_p4 = scmp.eq.s32.totalorder %s1059_s20, 0 }
  0x30   : > { %s1453_s29 = smov (%p35_p1, %s33_s29), 0  ;;  %p1428_p8 = scmp.eq.s32.totalorder %s1132_s21, 1 }
  0x31   : > { %1426 = sst [smem:[#allocation15_spill]] %s1453_s29  ;;  %p1193_p6 = por %p50_p4, %p49_p2 }
  0x32   : > { %p1199_p10 = por %p1428_p8, %p49_p2  ;;  %s37_s6 = ssub.s32 %s1055_s19, %s1453_s29 }
  0x33   : > { %p781_p12 = scmp.lt.s32.totalorder %s1059_s20, 2  ;;  %p40_p0 = scmp.eq.s32.totalorder %s37_s6, 0 }
  0x34   : > { %s1429_s5 = scalar_select %p1199_p10, 1, 0 }
  0x35   : > { %s209_s27 = sand.u32 1, %s1059_s20   ;;  %s211_s7 = sand.u32 1, %s1047_s17  }
  0x36   : > { %s1209_s8 = scalar_select %p40_p0, %s1047_s17, %s42_s26  }
  0x37   : > { %s688_s9 = sshll.u32 %s211_s7, 3  ;;  %s712_s10 = sshll.u32 %s1055_s19, 7 }
  0x38   : > { %s1430_s0 = sld [smem:[#allocation16_spill]]  ;;  %s213_s14 = scalar_lea.vmem [#allocation2], %s688_s9 }
  0x39   : > { %s223_s22 = sshll.u32 %s213_s14, 4  ;;  %p1219_p3 = pnand %p781_p12, %p1193_p6  ;;  %s1223_s22 = int_to_ptr.vmem [resolvable:$true] %s223_s22 }
  0x3a   : > { %s1225_s26 = sshll.u32 %s211_s7, 5  ;;  %s1227_s11 = scalar_lea.sflag [#allocation3], %s209_s27 }
  0x3b   : > { %s1431_s6 = scalar_select %p1219_p3, 1, 0 }
  0x3c   : > { %p1416_p7 = pneg %p1219_p3 }
  0x3e   : > { %s1215_s13 = scalar_lea.hbm %s1430_s0, %s712_s10  ;;  %s882_s12 = scalar_lea.hbm %s1430_s0, 256 }
  0x3f   : > { %s877_s10 = scalar_lea.hbm %s1215_s13, 128  ;;  %p883_p2 = scmp.lt.u32.totalorder %s1215_s13, %s1430_s0 }
  0x40   : > { %p878_p5 = scmp.ne.s32.totalorder %s1215_s13, %s877_s10  ;;  %p884_p4 = scmp.lt.u32.totalorder %s882_s12, %s877_s10 }
  0x41   : > { %p886_p8 = scmp.lt.u32.totalorder %s877_s10, %s1215_s13 }
  0x42   : > { %p880_p9 = pnand %p1416_p7, %p878_p5  ;;  %p885_p6 = por %p884_p4, %p883_p2 }
  0x44   : > { %p881_p1 = pneg %p880_p9  ;;  %p887_p12 = por %p886_p8, %p885_p6 }
  0x46   : > { %p888_p0 = pnand %p887_p12, %p881_p1 }
  0x48   : > { %891 = shalt.err (!%p888_p0)
}
  0x49   : > { %s892_s27 = scalar_lea.vmem %s1223_s22, 128  ;;  %s1064_s7 = smov [#allocation2]  }
  0x4a   : > { %p893_p5 = scmp.ne.s32.totalorder %s1223_s22, %s892_s27  ;;  %s897_s30 = sshll.u32 %s1064_s7, 4  ;;  %s898_s30 = int_to_ptr.vmem [resolvable:$false] %s897_s30 }
  0x4b   : > { %s899_s1 = scalar_lea.vmem %s898_s30, 256  ;;  %p900_p10 = scmp.lt.s32.totalorder %s1223_s22, %s898_s30 }
  0x4c   : > { %p895_p9 = pnand %p893_p5, %p1416_p7  ;;  %p901_p2 = scmp.lt.s32.totalorder %s899_s1, %s892_s27 }
  0x4e   : > { %p896_p13 = pneg %p895_p9  ;;  %p902_p4 = por %p901_p2, %p900_p10 }
  0x50   : > { %p903_p6 = pnand %p902_p4, %p896_p13 }
  0x52   : > { %906 = shalt.err (!%p903_p6)
}
  0x53   : > { %771 = dma.hbm_to_vmem [thread:$0]  (!%p1219_p3), %s1215_s13, 128, %s1223_s22, %s1227_s11  }
  0x54   : > { %s713_s10 = sshll.u32 %s1055_s19, 9  ;;  %s234_s9 = scalar_lea.vmem [#allocation7], %s1225_s26 }
  0x55   : > { %s241_s12 = sshll.u32 %s234_s9, 4  ;;  %s1065_s14 = smov [#allocation8]   ;;  %s1257_s12 = int_to_ptr.vmem [resolvable:$true] %s241_s12 }
  0x56   : > { %s195_s7 = sshll.u32 %s1065_s14, 4  ;;  %s907_s1 = scalar_lea.hbm %s1408_s3, 4096  ;;  %s196_s7 = int_to_ptr.vmem [resolvable:$true] %s195_s7 }
  0x57   : > { %p908_p13 = scmp.ne.s32.totalorder %s1408_s3, %s907_s1  ;;  %p1432_p10 = pneg %p1160_p11 }
  0x58   : > { %p914_p12 = scmp.lt.u32.totalorder %s907_s1, %s1408_s3 }
  0x59   : > { %p910_p1 = pnand %p908_p13, %p1432_p10 }
  0x5b   : > { %p911_p8 = pneg %p910_p1 }
  0x5d   : > { %p916_p0 = pnand %p914_p12, %p911_p8 }
  0x5f   : > { %919 = shalt.err (!%p916_p0)
}
  0x60   : > { %s920_s26 = scalar_lea.vmem %s196_s7, 4096  ;;  %p1433_p9 = pmov %p1432_p10 }
  0x61   : > { %p921_p5 = scmp.ne.s32.totalorder %s196_s7, %s920_s26  ;;  %p928_p6 = scmp.lt.s32.totalorder %s196_s7, %s196_s7 }
  0x62   : > { %p929_p7 = scmp.lt.s32.totalorder %s920_s26, %s920_s26 }
  0x63   : > { %p923_p2 = pnand %p921_p5, %p1433_p9 }
  0x64   : > { %p930_p3 = por %p929_p7, %p928_p6 }
  0x65   : > { %p924_p4 = pneg %p923_p2 }
  0x67   : > { %p931_p10 = pnand %p930_p3, %p924_p4 }
  0x69   : > { %934 = shalt.err (!%p931_p10)
}
  0x6a   : > { %s1066_s0 = smov 256   ;;  %s1067_s29 = smov 16  }
  0x6b   : > { %767 = dma.hbm_to_vmem [thread:$0]  (!%p1160_p11), %s1408_s3, 4096, %s196_s7, [#allocation6], %s1066_s0, %s1066_s0, %s1067_s29  }
  0x6c   : > { %s1284_s1 = scalar_lea.hbm %s1407_s2, %s713_s10  ;;  %p1434_p7 = scmp.ne.s32.totalorder %s1431_s6, 0 }
  0x6d   : > { %s935_s13 = scalar_lea.hbm %s1284_s1, 512  ;;  %s940_s7 = scalar_lea.hbm %s1407_s2, 1024 }
  0x6e   : > { %p936_p3 = scmp.ne.s32.totalorder %s1284_s1, %s935_s13  ;;  %p1435_p13 = pneg %p1434_p7 }
  0x6f   : > { %p941_p11 = scmp.lt.u32.totalorder %s1284_s1, %s1407_s2  ;;  %p942_p12 = scmp.lt.u32.totalorder %s940_s7, %s935_s13 }
  0x70   : > { %p938_p1 = pnand %p936_p3, %p1435_p13  ;;  %p944_p5 = scmp.lt.u32.totalorder %s935_s13, %s1284_s1 }
  0x71   : > { %p943_p0 = por %p942_p12, %p941_p11 }
  0x72   : > { %p939_p8 = pneg %p938_p1 }
  0x73   : > { %p945_p9 = por %p944_p5, %p943_p0 }
  0x75   : > { %p946_p2 = pnand %p945_p9, %p939_p8 }
  0x77   : > { %949 = shalt.err (!%p946_p2)
}
  0x78   : > { %s950_s10 = scalar_lea.vmem %s1257_s12, 512  ;;  %p1436_p6 = pmov %p1435_p13 }
  0x79   : > { %p951_p4 = scmp.ne.s32.totalorder %s1257_s12, %s950_s10  ;;  %s1068_s29 = smov [#allocation7]  }
  0x7a   : > { %s955_s9 = sshll.u32 %s1068_s29, 4  ;;  %s956_s9 = int_to_ptr.vmem [resolvable:$false] %s955_s9 }
  0x7b   : > { %p953_p10 = pnand %p951_p4, %p1436_p6  ;;  %s957_s14 = scalar_lea.vmem %s956_s9, 1024 }
  0x7c   : > { %p958_p13 = scmp.lt.s32.totalorder %s1257_s12, %s956_s9  ;;  %p959_p1 = scmp.lt.s32.totalorder %s957_s14, %s950_s10 }
  0x7d   : > { %p954_p3 = pneg %p953_p10 }
  0x7e   : > { %p960_p11 = por %p959_p1, %p958_p13 }
  0x80   : > { %p961_p12 = pnand %p960_p11, %p954_p3 }
  0x82   : > { %964 = shalt.err (!%p961_p12)
}
  0x83   : > { %s1069_s27 = smov 128   ;;  %s1070_s30 = smov 8  }
  0x84   : > { %774 = dma.hbm_to_vmem [thread:$0]  (!%p1434_p7), %s1284_s1, 512, %s1257_s12, %s1227_s11, %s1069_s27, %s1069_s27, %s1070_s30  }
  0x85   : > { %p1437_p8 = scmp.ne.s32.totalorder %s1423_s25, 0 }
  0x86   : > { %s255_s13 = sand.u32 (!%p1437_p8), 1, %s1132_s21   ;;  %s1314_s28 = sand.u32 (!%p1437_p8), 1, %s1043_s16  }
  0x87   : > { %253 = sbr.rel (%p1437_p8) target bundleno = 431 (0x1af), region = 36  ;;  %s695_s22 = sshll.u32 (!%p1437_p8), %s1314_s28, 3 }
  0x88   : > { %s256_s7 = scalar_lea.sflag (!%p1437_p8), [#allocation3], %s255_s13  ;;  %s1317_s26 = scalar_lea.vmem (!%p1437_p8), [#allocation2], %s695_s22 }
  0x89   : > { %p1438_p0 = scmp.ne.s32.totalorder (!%p1437_p8), %s1421_s23, 0 }
  0x8e   : > { %1018 = dma.done.wait (%p1438_p0), %s256_s7, 128  }
  0x8f   : > { %1020 = vsyncadd (%p1438_p0), %s256_s7, 4294967168  ;;  %p1439_p7 = scmp.eq.s32.totalorder %s1132_s21, 0 }
  0x91   : > { %1022 = dma.done.wait (%p1439_p7), [#allocation6], 256   ;;  %p1440_p5 = pmov %p1439_p7 }
  0x92   : > { %s697_s25 = sshll.u32 %s1314_s28, 5 }
  0x93   : > { %1024 = vsyncadd (%p1440_p5), [#allocation6], 4294967040  ;;  %s1328_s6 = scalar_lea.vmem [#allocation7], %s697_s25 }
  0x94   : > { %1026 = dma.done.wait (%p1438_p0), %s256_s7, 512  }
  0x95   : > { %1028 = vsyncadd (%p1438_p0), %s256_s7, 4294966784  ;;  %p1441_p9 = pmov %p1440_p5 }
  0x96   : > { %p1442_p2 = pmov %p1440_p5 }
  0x97   : > { %1030 = dma.done.wait (%p1441_p9), [#allocation6], 4096  }
  0x98   : > { %1032 = vsyncadd (%p1442_p2), [#allocation6], 4294963200  ;;  %v1071_v0 = vmov 0   ;;  %v1072_v1 = vmov 0.0   ;;  %v320_v2 = vld [vmem:[#allocation8 + $0x8] sm:$0xff]  ;;  %v322_v3 = vld [vmem:[#allocation8 + $0x18] sm:$0xff] }
  0x99   : > { %501 = vmatprep.mubr.bf16.mxu1 %v1071_v0  ;;  %415 = vmatprep.mubr.f32.mxu0 %v1072_v1  ;;  %v319_v4 = vld [vmem:[#allocation8] sm:$0xff]  ;;  %v715_v5 = vpack.c.bf16 %v322_v3, %v320_v2  ;;  %v321_v6 = vld [vmem:[#allocation8 + $0x10] sm:$0xff]  ;;  %v324_v7 = vld [vmem:[#allocation8 + $0x28] sm:$0xff]  ;;  %vm462_vm0 = vcmask 1043456   ;;  %vm455_vm1 = vcmask 64512   ;;  %s699_s21 = sshll.u32 %s1314_s28, 6 }
  0x9a   : > { %v326_v8 = vld [vmem:[#allocation8 + $0x38] sm:$0xff]  ;;  %v717_v9 = vpack.c.bf16 %v321_v6, %v319_v4  ;;  %v323_v11 = vld [vmem:[#allocation8 + $0x20] sm:$0xff]  ;;  %v325_v12 = vld [vmem:[#allocation8 + $0x30] sm:$0xff]  ;;  %s305_s23 = scalar_lea.vmem [#allocation9], %s699_s21  ;;  %s714_s12 = sshll.u32 %s1051_s18, 10 }
  0x9b   : > { %v719_v10 = vpack.c.bf16 %v326_v8, %v324_v7  ;;  %v328_v13 = vld [vmem:[#allocation8 + $0x48] sm:$0xff]  ;;  %716 = vmatprep.subr.bf16.mxu0 %v715_v5  ;;  %v330_v14 = vld [vmem:[#allocation8 + $0x58] sm:$0xff]  ;;  %v721_v15 = vpack.c.bf16 %v325_v12, %v323_v11  ;;  %v327_v17 = vld [vmem:[#allocation8 + $0x40] sm:$0xff]  ;;  %s554_s11 = sshll.u32 %s305_s23, 4  ;;  %s1356_s10 = scalar_lea.hbm %s1409_s4, %s714_s12  ;;  %s1351_s11 = int_to_ptr.vmem [resolvable:$true] %s554_s11 }
  0x9c   : > { %718 = vmatpush1.bf16.msra.mxu0 %v717_v9  ;;  %v723_v16 = vpack.c.bf16 %v330_v14, %v328_v13  ;;  %v329_v18 = vld [vmem:[#allocation8 + $0x50] sm:$0xff]  ;;  %v332_v19 = vld [vmem:[#allocation8 + $0x68] sm:$0xff]  ;;  %v334_v20 = vld [vmem:[#allocation8 + $0x78] sm:$0xff]  ;;  %s539_s18 = scalar_lea.sflag [#allocation4], %s1314_s28  ;;  %s965_s29 = scalar_lea.vmem %s1351_s11, 1024 }
  0x9d   : > { %720 = vmatprep.subr.bf16.mxu0 %v719_v10  ;;  %v725_v21 = vpack.c.bf16 %v329_v18, %v327_v17  ;;  %v727_v22 = vpack.c.bf16 %v334_v20, %v332_v19  ;;  %v331_v23 = vld [vmem:[#allocation8 + $0x60] sm:$0xff]  ;;  %v333_v24 = vld [vmem:[#allocation8 + $0x70] sm:$0xff]  ;;  %v336_v26 = vld [vmem:[#allocation8 + $0x88] sm:$0xff]  ;;  %p966_p4 = scmp.ne.s32.totalorder %s1351_s11, %s965_s29  ;;  %p1443_p6 = scmp.ne.s32.totalorder %s1429_s5, 0 }
  0x9e   : > { %v314_v25 = vld [vmem:[%s1317_s26] sm:$0xff]  ;;  %v338_v27 = vld [vmem:[#allocation8 + $0x98] sm:$0xff]  ;;  %v729_v30 = vpack.c.bf16 %v333_v24, %v331_v23  ;;  %v847_v32 = vld [vmem:[#allocation5] sm:$0xff]   ;;  %s1073_s9 = smov [#allocation9]  }
  0x9f   : > { %v703_v28 = vcombine.high %v314_v25, %v314_v25  ;;  %v702_v29 = vcombine.low %v314_v25, %v314_v25  ;;  %v731_v33 = vpack.c.bf16 %v338_v27, %v336_v26  ;;  %v335_v34 = vld [vmem:[#allocation8 + $0x80] sm:$0xff]  ;;  %v337_v35 = vld [vmem:[#allocation8 + $0x90] sm:$0xff]  ;;  %v340_v36 = vld [vmem:[#allocation8 + $0xa8] sm:$0xff]  ;;  %p967_p10 = pnand %p966_p4, %p1443_p6  ;;  %s969_s14 = sshll.u32 %s1073_s9, 4  ;;  %s970_s14 = int_to_ptr.vmem [resolvable:$false] %s969_s14 }
  0xa0   : > { %722 = vmatpush1.bf16.msra.mxu0 %v721_v15  ;;  %v342_v37 = vld [vmem:[#allocation8 + $0xb8] sm:$0xff]  ;;  %v733_v38 = vpack.c.bf16 %v337_v35, %v335_v34  ;;  %v339_v40 = vld [vmem:[#allocation8 + $0xa0] sm:$0xff]  ;;  %v341_v41 = vld [vmem:[#allocation8 + $0xb0] sm:$0xff]  ;;  %s971_s27 = scalar_lea.vmem %s970_s14, 2048  ;;  %p972_p13 = scmp.lt.s32.totalorder %s1351_s11, %s970_s14 }
  0xa1   : > { %724 = vmatprep.subr.bf16.mxu0 %v723_v16  ;;  %704 = vmatprep.subr.msk.bf16.mxu1 %vm462_vm0, %v703_v28  ;;  %v464_v31 = vsel %vm462_vm0, %v702_v29, 0  ;;  %v735_v39 = vpack.c.bf16 %v342_v37, %v340_v36  ;;  %v344_v42 = vld [vmem:[#allocation8 + $0xc8] sm:$0xff]  ;;  %v346_v43 = vld [vmem:[#allocation8 + $0xd8] sm:$0xff]  ;;  %v737_v44 = vpack.c.bf16 %v341_v41, %v339_v40  ;;  %v343_v47 = vld [vmem:[#allocation8 + $0xc0] sm:$0xff]  ;;  %p968_p3 = pneg %p967_p10  ;;  %p973_p1 = scmp.lt.s32.totalorder %s971_s27, %s965_s29 }
  0xa2   : > { %470 = vmatpush1.bf16.msra.mxu1 %v464_v31  ;;  %v848_v45 = vld [vmem:[#allocation5 + $0x8] sm:$0xff]   ;;  %v739_v46 = vpack.c.bf16 %v346_v43, %v344_v42  ;;  %v345_v48 = vld [vmem:[#allocation8 + $0xd0] sm:$0xff]  ;;  %v348_v49 = vld [vmem:[#allocation8 + $0xe8] sm:$0xff] }
  0xa3   : > { %v350_v50 = vld [vmem:[#allocation8 + $0xf8] sm:$0xff]  ;;  %v741_v51 = vpack.c.bf16 %v345_v48, %v343_v47  ;;  %v347_v53 = vld [vmem:[#allocation8 + $0xe0] sm:$0xff]  ;;  %v349_v54 = vld [vmem:[#allocation8 + $0xf0] sm:$0xff]  ;;  %p974_p11 = por %p973_p1, %p972_p13 }
  0xa4   : > { %726 = vmatpush1.bf16.msra.mxu0 %v725_v21  ;;  %v743_v52 = vpack.c.bf16 %v350_v50, %v348_v49  ;;  %v745_v55 = vpack.c.bf16 %v349_v54, %v347_v53  ;;  %v315_v56 = vld [vmem:[%s1328_s6] sm:$0xff]  ;;  %v316_v57 = vld [vmem:[%s1328_s6 + $0x8] sm:$0xff]  ;;  %v317_v58 = vld [vmem:[%s1328_s6 + $0x10] sm:$0xff] }
  0xa5   : > { %728 = vmatprep.subr.bf16.mxu0 %v727_v22  ;;  %705 = vmatmul.mubr.msk.bf16.vlgmr.msra.gmra.mrb[0].mxu1 %vm455_vm1, %v847_v32  ;;  %v318_v59 = vld [vmem:[%s1328_s6 + $0x18] sm:$0xff]  ;;  %p975_p12 = pnand %p974_p11, %p968_p3 }
  0xa6   : > { %511 = vmatprep.mubr.bf16.mxu1 %v1071_v0 }
  0xa8   : > { %730 = vmatpush1.bf16.msra.mxu0 %v729_v30 }
  0xa9   : > { %732 = vmatprep.subr.bf16.mxu0 %v731_v33 }
  0xac   : > { %734 = vmatpush1.bf16.msra.mxu0 %v733_v38 }
  0xad   : > { %736 = vmatprep.subr.bf16.mxu0 %v735_v39  ;;  %706 = vmatmul.mubr.msk.bf16.gmra.mrb[4].mxu1 %vm455_vm1, %v848_v45 }
  0xb0   : > { %738 = vmatpush1.bf16.msra.mxu0 %v737_v44 }
  0xb1   : > { %740 = vmatprep.subr.bf16.mxu0 %v739_v46 }
  0xb4   : > { %742 = vmatpush1.bf16.msra.mxu0 %v741_v51 }
  0xb5   : > { %744 = vmatprep.subr.bf16.mxu0 %v743_v52 }
  0xb8   : > { %746 = vmatpush1.bf16.msra.mxu0 %v745_v55 }
  0xbb   : > { %416 = vmatmul.mubr.f32.vlgmr.msra.gmra.mrb[0].mxu0 %v315_v56 }
  0xbc   : > { %421 = vmatprep.mubr.f32.mxu0 %v1072_v1 }
  0xbf   : > { %422 = vmatmul.mubr.f32.gmra.mrb[2].mxu0 %v316_v57 }
  0xc0   : > { %427 = vmatprep.mubr.f32.mxu0 %v1072_v1 }
  0xc3   : > { %428 = vmatmul.mubr.f32.gmra.mrb[4].mxu0 %v317_v58 }
  0xc4   : > { %433 = vmatprep.mubr.f32.mxu0 %v1072_v1 }
  0xc7   : > { %434 = vmatmul.mubr.f32.gmra.mrb[6].mxu0 %v318_v59 }
 0x178   : > { %v503_v60 = vpop.f32.mrb[0].mxu1 }
 0x179   : > { %v505_v61 = vpop.f32.mrb[1].mxu1 }
 0x17a   : > { %v507_v62 = vpop.f32.mrb[2].mxu1 }
 0x17b   : > { %v509_v63 = vpop.f32.mrb[3].mxu1 }
 0x180   : > { %v513_v0 = vpop.f32.mrb[4].mxu1 }
 0x181   : > { %v515_v2 = vpop.f32.mrb[5].mxu1 }
 0x182   : > { %v517_v3 = vpop.f32.mrb[6].mxu1 }
 0x183   : > { %v519_v4 = vpop.f32.mrb[7].mxu1 }
 0x18e   : > { %v417_v5 = vpop.f32.mrb[0].mxu0 }
 0x18f   : > { %v504_v6 = vadd.f32 %v503_v60, %v417_v5  ;;  %v419_v7 = vpop.f32.mrb[1].mxu0 }
 0x190   : > { %v506_v8 = vadd.f32 %v505_v61, %v419_v7 }
 0x191   : > { %v522_v9 = vmax.f32 %v504_v6, 0.0 }
 0x192   : > { %v523_v10 = vmax.f32 %v506_v8, 0.0  ;;  %v423_v11 = vpop.f32.mrb[2].mxu0 }
 0x193   : > { %530 = vst [vmem:[%s305_s23] sm:$0xff] %v522_v9  ;;  %v508_v1 = vadd.f32 %v507_v62, %v423_v11  ;;  %v425_v12 = vpop.f32.mrb[3].mxu0 }
 0x194   : > { %531 = vst [vmem:[%s305_s23 + $0x8] sm:$0xff] %v523_v10  ;;  %v510_v13 = vadd.f32 %v509_v63, %v425_v12 }
 0x195   : > { %v524_v14 = vmax.f32 %v508_v1, 0.0 }
 0x196   : > { %v525_v15 = vmax.f32 %v510_v13, 0.0  ;;  %v429_v16 = vpop.f32.mrb[4].mxu0 }
 0x197   : > { %532 = vst [vmem:[%s305_s23 + $0x10] sm:$0xff] %v524_v14  ;;  %v514_v17 = vadd.f32 %v513_v0, %v429_v16  ;;  %v431_v18 = vpop.f32.mrb[5].mxu0 }
 0x198   : > { %533 = vst [vmem:[%s305_s23 + $0x18] sm:$0xff] %v525_v15  ;;  %v516_v19 = vadd.f32 %v515_v2, %v431_v18 }
 0x199   : > { %v526_v20 = vmax.f32 %v514_v17, 0.0 }
 0x19a   : > { %v527_v21 = vmax.f32 %v516_v19, 0.0  ;;  %v435_v22 = vpop.f32.mrb[6].mxu0 }
 0x19b   : > { %534 = vst [vmem:[%s305_s23 + $0x20] sm:$0xff] %v526_v20  ;;  %v518_v23 = vadd.f32 %v517_v3, %v435_v22  ;;  %v437_v24 = vpop.f32.mrb[7].mxu0 }
 0x19c   : > { %535 = vst [vmem:[%s305_s23 + $0x28] sm:$0xff] %v527_v21  ;;  %v520_v25 = vadd.f32 %v519_v4, %v437_v24 }
 0x19d   : > { %v528_v26 = vmax.f32 %v518_v23, 0.0 }
 0x19e   : > { %v529_v27 = vmax.f32 %v520_v25, 0.0 }
 0x19f   : > { %536 = vst [vmem:[%s305_s23 + $0x30] sm:$0xff] %v528_v26 }
 0x1a0   : > { %537 = vst [vmem:[%s305_s23 + $0x38] sm:$0xff] %v529_v27 }
 0x1a1   : > { %978 = shalt.err (!%p975_p12)
}
 0x1a2   : > { %s979_s30 = scalar_lea.hbm %s1356_s10, 1024  ;;  %s983_s7 = scalar_lea.hbm %s1409_s4, 2048 }
 0x1a3   : > { %p980_p8 = scmp.ne.s32.totalorder %s1356_s10, %s979_s30  ;;  %p984_p5 = scmp.lt.u32.totalorder %s1356_s10, %s1409_s4 }
 0x1a4   : > { %p985_p9 = scmp.lt.u32.totalorder %s983_s7, %s979_s30  ;;  %p987_p4 = scmp.lt.u32.totalorder %s979_s30, %s1356_s10 }
 0x1a5   : > { %p981_p0 = pnand %p980_p8, %p1443_p6 }
 0x1a6   : > { %p986_p2 = por %p985_p9, %p984_p5 }
 0x1a7   : > { %p982_p7 = pneg %p981_p0 }
 0x1a8   : > { %p988_p10 = por %p987_p4, %p986_p2 }
 0x1aa   : > { %p989_p3 = pnand %p988_p10, %p982_p7 }
 0x1ac   : > { %992 = shalt.err (!%p989_p3)
}
 0x1ad   : > { %s1074_s6 = smov 256   ;;  %s1075_s21 = smov 16  }
 0x1ae   : > { %759 = dma.vmem_to_hbm [thread:$0]  (%p1443_p6), %s1351_s11, 1024, %s1356_s10, %s539_s18, %s1074_s6, %s1074_s6, %s1075_s21  }
 0x1af PF: > { %s569_s23 = sand.u32 1, %s1039_s15   ;;  %p1444_p13 = scmp.ne.s32.totalorder %s1422_s24, 0 }
 0x1b0   : > { %p1445_p1 = scmp.ge.s32.totalorder %s1059_s20, 2  ;;  %s570_s12 = scalar_lea.sflag [#allocation4], %s569_s23 }
 0x1b2   : > { %p776_p11 = pnand %p1445_p1, %p1444_p13 }
 0x1b4   : > { %1034 = dma.done.wait (!%p776_p11), %s570_s12, 1024  }
 0x1b5   : > { %1036 = vsyncadd (!%p776_p11), %s570_s12, 4294966272  ;;  %s21_s20 = sadd.s32 1, %s1059_s20   ;;  %s1446_s5 = sld [smem:[#allocation15_spill]] }
 0x1b6   : > { %p18_p12 = scmp.ge.s32.totalorder %s21_s20, 4   ;;  %s1447_s15 = smov %s1043_s16 }
 0x1b7   : > { %s1448_s16 = smov %s1047_s17  ;;  %s1449_s17 = smov %s1209_s8 }
 0x1b8   : > { %s1450_s18 = smov %s1055_s19  ;;  %20 = sbr.rel (!%p18_p12) target bundleno = 10 (0xa), region = 101 }
 0x1bb   : > { %s1451_s19 = smov %s1446_s5 }
 0x1bf   :  { %575 = vsyncpa [#allocation3], 1 }
 0x1c0   :  { %577 = vsyncpa [#allocation3 + $0x1], 1 }
 0x1c1   :  { %578 = vsyncpa [#allocation6], 1 }
 0x1c2   :  { %579 = vsyncpa [#allocation4], 1 }
 0x1c3   :  { %581 = vsyncpa [#allocation4 + $0x1], 1 }

</bundles_post_ra>
